<compile_context>
chip_gen: v5e
topology: v5e:2x2
jax: 0.10.0
libtpu: 0.0.40
codegen_flags: <defaults>
</compile_context>

<pallas_src>
import jax
import jax.numpy as jnp
from jax import lax
from jax.experimental import pallas as pl
from jax.experimental.pallas import tpu as pltpu


_INV_SQRT2 = 0.7071067811865476


def _round_up(x: int, m: int) -> int:
    return (x + m - 1) // m * m


def _pad_dim(d: int) -> int:
    # Keep 128-aligned dims untouched (zero-copy path); when padding is needed anyway,
    # pad to a 256 multiple to match the 2x256x256 MXU on v6e/v7x (128 is native on v5e).
    if d % 128 == 0:
        return d
    if d <= 128:
        return 128
    return _round_up(d, 256)


def _gelu_exact(h):
    # torch.nn.GELU default (approximate='none'), computed in f32.
    return 0.5 * h * (1.0 + lax.erf(h * _INV_SQRT2))
    # TODO(synk): optionally expose a tanh-approx GELU for v5e if erf EUP cost ever binds.


# -----------------------------------------------------------------------------
# Kernels
# -----------------------------------------------------------------------------
def _mlp_kernel_resident(x_ref, w1_ref, b1_ref, w2_ref, b2_ref, o_ref):
    # Full weights resident in VMEM; single pass over H.
    x = x_ref[...].astype(w1_ref.dtype)                     # f32 tile -> bf16 in-kernel
    h = jnp.dot(x, w1_ref[...], preferred_element_type=jnp.float32)
    h = _gelu_exact(h + b1_ref[...])                        # bias + GELU in f32
    y = jnp.dot(h.astype(w2_ref.dtype), w2_ref[...],
                preferred_element_type=jnp.float32)
    o_ref[...] = (y + b2_ref[...]).astype(o_ref.dtype)      # drop1/drop2: p=0 -> identity


def _mlp_kernel_htiled_f32out(x_ref, w1_ref, b1_ref, w2_ref, b2_ref, o_ref):
    # H-tiled streaming kernel; f32 output block is resident across the H axis,
    # so accumulate directly into it (no separate scratch).
    j = pl.program_id(1)

    @pl.when(j == 0)
    def _init():
        o_ref[...] = jnp.zeros_like(o_ref)

    x = x_ref[...].astype(w1_ref.dtype)
    h = jnp.dot(x, w1_ref[...], preferred_element_type=jnp.float32)
    h = _gelu_exact(h + b1_ref[...])
    o_ref[...] += jnp.dot(h.astype(w2_ref.dtype), w2_ref[...],
                          preferred_element_type=jnp.float32)

    @pl.when(j == pl.num_programs(1) - 1)
    def _finalize():
        o_ref[...] += b2_ref[...]


def _mlp_kernel_htiled_acc(x_ref, w1_ref, b1_ref, w2_ref, b2_ref, o_ref, acc_ref):
    # H-tiled streaming kernel with an f32 accumulator for non-f32 outputs.
    j = pl.program_id(1)

    @pl.when(j == 0)
    def _init():
        acc_ref[...] = jnp.zeros_like(acc_ref)

    x = x_ref[...].astype(w1_ref.dtype)
    h = jnp.dot(x, w1_ref[...], preferred_element_type=jnp.float32)
    h = _gelu_exact(h + b1_ref[...])
    acc_ref[...] += jnp.dot(h.astype(w2_ref.dtype), w2_ref[...],
                            preferred_element_type=jnp.float32)

    @pl.when(j == pl.num_programs(1) - 1)
    def _finalize():
        o_ref[...] = (acc_ref[...] + b2_ref[...]).astype(o_ref.dtype)


# -----------------------------------------------------------------------------
# Parameter preparation (do once, outside the hot path)
# -----------------------------------------------------------------------------
def prepare_mlp_params(w1, b1, w2, b2, *, compute_dtype=jnp.bfloat16):
    """Pad/cast weights ONCE.  w1: (Din, H), w2: (H, Dout) -- pre-transposed
    relative to torch nn.Linear's (out, in) layout.  b1/b2 may be None."""
    Din, H = w1.shape
    H2, Dout = w2.shape
    assert H == H2, "w1/w2 hidden dims mismatch"
    Din_p, H_p, Dout_p = _pad_dim(Din), _pad_dim(H), _pad_dim(Dout)

    def pad2(a, r, c, dt):
        a = a.astype(dt)
        if a.shape == (r, c):
            return a
        return jnp.zeros((r, c), dt).at[:a.shape[0], :a.shape[1]].set(a)

    w1p = pad2(w1, Din_p, H_p, compute_dtype)
    w2p = pad2(w2, H_p, Dout_p, compute_dtype)
    b1v = jnp.zeros((H,), jnp.float32) if b1 is None else b1.astype(jnp.float32)
    b2v = jnp.zeros((Dout,), jnp.float32) if b2 is None else b2.astype(jnp.float32)
    b1p = pad2(b1v.reshape(1, -1), 1, H_p, jnp.float32)
    b2p = pad2(b2v.reshape(1, -1), 1, Dout_p, jnp.float32)
    return {"w1": w1p, "b1": b1p, "w2": w2p, "b2": b2p, "dims": (Din, H, Dout)}


def _vmem_caps():
    """(tile budget, compiler vmem limit) in bytes for the current generation."""
    try:
        cap = int(pltpu.get_tpu_info().vmem_capacity_bytes)
    except Exception:
        cap = 64 << 20                       # conservative fallback (v7x per-TC size)
    # Leave headroom for Mosaic internal scratch / semaphores.
    headroom = (16 << 20) if cap <= (64 << 20) else (28 << 20)
    budget = max(cap - headroom, 24 << 20)
    limit = max(cap - (2 << 20), budget)
    return budget, limit


# -----------------------------------------------------------------------------
# Wrapper
# -----------------------------------------------------------------------------
def mlp_pallas(x, params, *, tm=512, out_dtype=None, vmem_budget_bytes=None):
    """Fused MLP forward.  x: (..., Din).  params from prepare_mlp_params."""
    w1p, b1p, w2p, b2p = params["w1"], params["b1"], params["w2"], params["b2"]
    Din, H, Dout = params["dims"]
    assert x.shape[-1] == Din
    Din_p, H_p = w1p.shape
    Dout_p = w2p.shape[1]
    cdtype = w1p.dtype
    out_dtype = x.dtype if out_dtype is None else out_dtype

    lead = x.shape[:-1]
    x2 = x.reshape(-1, Din)
    N = x2.shape[0]

    budget, vmem_limit = _vmem_caps()
    if vmem_budget_bytes is not None:
        budget = int(vmem_budget_bytes)
        vmem_limit = max(vmem_limit, budget)

    x_isz = x2.dtype.itemsize
    o_isz = jnp.dtype(out_dtype).itemsize
    c_isz = jnp.dtype(cdtype).itemsize

    # Token tile: multiple of 16 (bf16 sublane packing), clamped to N.
    tm_req = max(16, min(_round_up(tm, 16), _round_up(N, 16)))

    def resident_footprint(tm_c):
        w_bytes = (w1p.size + w2p.size) * c_isz * 2              # 2 pipeline buffers (conservative)
        b_bytes = (b1p.size + b2p.size) * 4 * 2
        x_tile = 2 * tm_c * Din_p * x_isz
        o_tile = 2 * tm_c * Dout_p * o_isz
        interm = tm_c * (Din_p * c_isz + H_p * 4 + H_p * c_isz + Dout_p * 4)
        return w_bytes + b_bytes + x_tile + o_tile + interm

    # Prefer full weight residency (weights DMAed once); shrink tm if needed.
    tm_res = tm_req
    while resident_footprint(tm_res) > budget and tm_res > 128:
        nxt = max(128, _round_up(tm_res // 2, 16))
        if nxt == tm_res:
            break
        tm_res = nxt
    use_resident = resident_footprint(tm_res) <= budget

    if use_resident:
        tm_eff = tm_res
    else:
        # Streamed weights: arithmetic intensity w.r.t. the weight stream == tm,
        # so push the token tile toward 1024 (roofline on v6e/v7x needs ~640+).
        tm_eff = max(16, min(_round_up(max(tm, 1024), 16), _round_up(N, 16)))

        def tiled_footprint(tm_c, th_c):
            x_tile = 2 * tm_c * Din_p * x_isz
            w1_t = 2 * Din_p * th_c * c_isz
            w2_t = 2 * th_c * Dout_p * c_isz
            b_t = 2 * (th_c + Dout_p) * 4
            o_tile = 2 * tm_c * Dout_p * o_isz
            acc = 0 if jnp.dtype(out_dtype) == jnp.dtype(jnp.float32) else tm_c * Dout_p * 4
            interm = tm_c * (Din_p * c_isz + th_c * 4 + th_c * c_isz + Dout_p * 4)
            return x_tile + w1_t + w2_t + b_t + o_tile + acc + interm

        def largest_divisor_tile(total, unit, cap):
            best, t = unit, unit
            while t <= min(total, cap):
                if total % t == 0:
                    best = t
                t += unit
            return best

        th_eff = H_p
        while tiled_footprint(tm_eff, th_eff) > budget and th_eff > 128:
            th_eff = largest_divisor_tile(H_p, 128, th_eff - 128)
        while tiled_footprint(tm_eff, th_eff) > budget and tm_eff > 16:
            tm_eff = max(16, _round_up(tm_eff // 2, 16))

    # Pad x (activations only) when its dims are not already aligned.
    N_p = _round_up(N, tm_eff)
    if (N_p, Din_p) != (N, Din):
        xp = jnp.zeros((N_p, Din_p), x2.dtype).at[:N, :Din].set(x2)
    else:
        xp = x2

    if use_resident:
        gi = N_p // tm_eff
        tn_eff = Dout_p
        # v7x has 2 TensorCores: when the token grid is 1-wide, split Dout so both
        # cores get work (halves must stay 128-aligned).
        if gi == 1 and Dout_p >= 512 and Dout_p % 256 == 0:
            tn_eff = Dout_p // 2
        gn = Dout_p // tn_eff

        out = pl.pallas_call(
            _mlp_kernel_resident,
            out_shape=jax.ShapeDtypeStruct((N_p, Dout_p), out_dtype),
            grid_spec=pltpu.PrefetchScalarGridSpec(
                num_scalar_prefetch=0,
                grid=(gi, gn),
                in_specs=[
                    pl.BlockSpec((tm_eff, Din_p), lambda i, n: (i, 0)),   # x tile
                    pl.BlockSpec((Din_p, H_p), lambda i, n: (0, 0)),      # w1 (resident)
                    pl.BlockSpec((1, H_p), lambda i, n: (0, 0)),          # b1 (resident)
                    pl.BlockSpec((H_p, tn_eff), lambda i, n: (0, n)),     # w2 (resident / Dout slice)
                    pl.BlockSpec((1, tn_eff), lambda i, n: (0, n)),       # b2
                ],
                out_specs=pl.BlockSpec((tm_eff, tn_eff), lambda i, n: (i, n)),
            ),
            compiler_params=pltpu.CompilerParams(
                dimension_semantics=("parallel", "parallel"),
                vmem_limit_bytes=vmem_limit,
            ),
        )(xp, w1p, b1p, w2p, b2p)
    else:
        gi = N_p // tm_eff
        gj = H_p // th_eff
        if jnp.dtype(out_dtype) == jnp.dtype(jnp.float32):
            kernel = _mlp_kernel_htiled_f32out
            scratch = []
        else:
            kernel = _mlp_kernel_htiled_acc
            scratch = [pltpu.VMEM((tm_eff, Dout_p), jnp.float32)]
        # TODO(synk): on v5e consider pipeline_mode=pl.Buffered(3) for w1/w2 specs.
        out = pl.pallas_call(
            kernel,
            out_shape=jax.ShapeDtypeStruct((N_p, Dout_p), out_dtype),
            grid_spec=pltpu.PrefetchScalarGridSpec(
                num_scalar_prefetch=0,
                grid=(gi, gj),
                in_specs=[
                    pl.BlockSpec((tm_eff, Din_p), lambda i, j: (i, 0)),   # x tile
                    pl.BlockSpec((Din_p, th_eff), lambda i, j: (0, j)),   # w1 H-slice
                    pl.BlockSpec((1, th_eff), lambda i, j: (0, j)),       # b1 H-slice
                    pl.BlockSpec((th_eff, Dout_p), lambda i, j: (j, 0)),  # w2 H-slice
                    pl.BlockSpec((1, Dout_p), lambda i, j: (0, 0)),       # b2
                ],
                out_specs=pl.BlockSpec((tm_eff, Dout_p), lambda i, j: (i, 0)),
                scratch_shapes=scratch,
            ),
            compiler_params=pltpu.CompilerParams(
                dimension_semantics=("parallel", "arbitrary"),
                vmem_limit_bytes=vmem_limit,
            ),
        )(xp, w1p, b1p, w2p, b2p)

    if (N_p, Dout_p) != (N, Dout):
        out = out[:N, :Dout]
    return out.reshape(lead + (Dout,))


def mlp_reference(x, w1, b1, w2, b2):
    h = x @ w1 + b1
    h = 0.5 * h * (1.0 + lax.erf(h * _INV_SQRT2))
    return h @ w2 + b2


if __name__ == "__main__":
    key = jax.random.PRNGKey(0)

    # --- Test 1: tiny Mlp shapes (needs padding path) -----------------------
    B, S = 2, 8                  # N = 16 tokens
    in_features = 16
    hidden_features = 32
    out_features = in_features   # Mlp default: out_features = in_features

    kx, k1, kb1, k2, kb2, kx2, k12, k22 = jax.random.split(key, 8)
    x = jax.random.normal(kx, (B, S, in_features), dtype=jnp.float32)
    # Weights stored pre-transposed as (in, out) relative to torch's (out, in).
    w1 = jax.random.normal(k1, (in_features, hidden_features), jnp.float32) * 0.05
    b1 = jax.random.normal(kb1, (hidden_features,), jnp.float32) * 0.01
    w2 = jax.random.normal(k2, (hidden_features, out_features), jnp.float32) * 0.05
    b2 = jax.random.normal(kb2, (out_features,), jnp.float32) * 0.01

    params = prepare_mlp_params(w1, b1, w2, b2)
    out = jax.block_until_ready(mlp_pallas(x, params))
    ref = mlp_reference(x, w1, b1, w2, b2)
    assert out.shape == (B, S, out_features)
    assert jnp.allclose(out, ref, atol=2e-2, rtol=2e-2), "mismatch vs reference (test 1)"

    # --- Test 2: 128-aligned dims (zero-copy pass-through path) -------------
    Bn, Sn, Din2, H2, Dout2 = 2, 16, 128, 256, 128
    x2 = jax.random.normal(kx2, (Bn, Sn, Din2), dtype=jnp.float32)
    w1b = jax.random.normal(k12, (Din2, H2), jnp.float32) * 0.03
    w2b = jax.random.normal(k22, (H2, Dout2), jnp.float32) * 0.03
    b1b = jnp.zeros((H2,), jnp.float32)
    b2b = jnp.zeros((Dout2,), jnp.float32)
    params2 = prepare_mlp_params(w1b, b1b, w2b, b2b)
    out2 = jax.block_until_ready(mlp_pallas(x2, params2))
    ref2 = mlp_reference(x2, w1b, b1b, w2b, b2b)
    assert out2.shape == (Bn, Sn, Dout2)
    assert jnp.allclose(out2, ref2, atol=5e-2, rtol=5e-2), "mismatch vs reference (test 2)"

    print("KERNEL_OK")
</pallas_src>

<mosaic_0001>
module attributes {stable_mosaic.version = 11 : i64} {
  func.func @_mlp_kernel_resident(%arg0: i32, %arg1: i32, %arg2: memref<16x128xf32, #tpu.memory_space<vmem>>, %arg3: memref<128x128xbf16, #tpu.memory_space<vmem>>, %arg4: memref<1x128xf32, #tpu.memory_space<vmem>>, %arg5: memref<128x128xbf16, #tpu.memory_space<vmem>>, %arg6: memref<1x128xf32, #tpu.memory_space<vmem>>, %arg7: memref<16x128xf32, #tpu.memory_space<vmem>>) attributes {dimension_semantics = [#tpu.dimension_semantics<parallel>, #tpu.dimension_semantics<parallel>], iteration_bounds = array<i64: 1, 1>, scalar_prefetch = 0 : i64, scratch_operands = 0 : i64, tpu.core_type = #tpu.core_type<tc>, window_params = [{transform_indices = @transform_0, window_bounds = array<i64: 16, 128>}, {pipeline_mode = #tpu.pipeline_mode<synchronous>, transform_indices = @transform_1, window_bounds = array<i64: 128, 128>}, {pipeline_mode = #tpu.pipeline_mode<synchronous>, transform_indices = @transform_2, window_bounds = array<i64: 1, 128>}, {transform_indices = @transform_3, window_bounds = array<i64: 128, 128>}, {transform_indices = @transform_4, window_bounds = array<i64: 1, 128>}, {transform_indices = @transform_5, window_bounds = array<i64: 16, 128>}]} {
    %c0 = arith.constant 0 : index
    %c0_0 = arith.constant 0 : index
    %0 = vector.load %arg2[%c0, %c0_0] : memref<16x128xf32, #tpu.memory_space<vmem>>, vector<16x128xf32>
    %1 = arith.truncf %0 : vector<16x128xf32> to vector<16x128xbf16>
    %c0_1 = arith.constant 0 : index
    %c0_2 = arith.constant 0 : index
    %2 = vector.load %arg3[%c0_1, %c0_2] : memref<128x128xbf16, #tpu.memory_space<vmem>>, vector<128x128xbf16>
    %cst = arith.constant dense<0.000000e+00> : vector<16x128xf32>
    %3 = tpu.matmul %1, %2, %cst {dimension_numbers = #tpu.dot_dimension_numbers<[1], [0], [0], [1], [0, 0, 1, 1], [], []>} : vector<16x128xbf16>, vector<128x128xbf16>, vector<16x128xf32> -> vector<16x128xf32>
    %c0_3 = arith.constant 0 : index
    %c0_4 = arith.constant 0 : index
    %4 = vector.load %arg4[%c0_3, %c0_4] : memref<1x128xf32, #tpu.memory_space<vmem>>, vector<1x128xf32>
    %5 = vector.broadcast %4 : vector<1x128xf32> to vector<16x128xf32>
    %6 = arith.addf %3, %5 : vector<16x128xf32>
    %cst_5 = arith.constant 5.000000e-01 : f32
    %7 = vector.broadcast %cst_5 : f32 to vector<16x128xf32>
    %8 = arith.mulf %7, %6 : vector<16x128xf32>
    %cst_6 = arith.constant 0.707106769 : f32
    %9 = vector.broadcast %cst_6 : f32 to vector<16x128xf32>
    %10 = arith.mulf %6, %9 : vector<16x128xf32>
    %11 = math.erf %10 : vector<16x128xf32>
    %cst_7 = arith.constant 1.000000e+00 : f32
    %12 = vector.broadcast %cst_7 : f32 to vector<16x128xf32>
    %13 = arith.addf %12, %11 : vector<16x128xf32>
    %14 = arith.mulf %8, %13 : vector<16x128xf32>
    %15 = arith.truncf %14 : vector<16x128xf32> to vector<16x128xbf16>
    %c0_8 = arith.constant 0 : index
    %c0_9 = arith.constant 0 : index
    %16 = vector.load %arg5[%c0_8, %c0_9] : memref<128x128xbf16, #tpu.memory_space<vmem>>, vector<128x128xbf16>
    %cst_10 = arith.constant dense<0.000000e+00> : vector<16x128xf32>
    %17 = tpu.matmul %15, %16, %cst_10 {dimension_numbers = #tpu.dot_dimension_numbers<[1], [0], [0], [1], [0, 0, 1, 1], [], []>} : vector<16x128xbf16>, vector<128x128xbf16>, vector<16x128xf32> -> vector<16x128xf32>
    %c0_11 = arith.constant 0 : index
    %c0_12 = arith.constant 0 : index
    %18 = vector.load %arg6[%c0_11, %c0_12] : memref<1x128xf32, #tpu.memory_space<vmem>>, vector<1x128xf32>
    %19 = vector.broadcast %18 : vector<1x128xf32> to vector<16x128xf32>
    %20 = arith.addf %17, %19 : vector<16x128xf32>
    %c0_13 = arith.constant 0 : index
    %c0_14 = arith.constant 0 : index
    %21 = vector.load %arg7[%c0_13, %c0_14] : memref<16x128xf32, #tpu.memory_space<vmem>>, vector<16x128xf32>
    tpu.vector_store %arg7[%c0_13, %c0_14], %20 {strides = array<i32>} : memref<16x128xf32, #tpu.memory_space<vmem>>, vector<16x128xf32>,
    return
  }
  func.func @transform_0(%arg0: i32, %arg1: i32) -> (i32, i32) {
    %c0_i32 = arith.constant 0 : i32
    %c0_i32_0 = arith.constant 0 : i32
    return %arg0, %c0_i32 : i32, i32
  }
  func.func @transform_1(%arg0: i32, %arg1: i32) -> (i32, i32) {
    %c0_i32 = arith.constant 0 : i32
    %c0_i32_0 = arith.constant 0 : i32
    %c0_i32_1 = arith.constant 0 : i32
    return %c0_i32, %c0_i32_0 : i32, i32
  }
  func.func @transform_2(%arg0: i32, %arg1: i32) -> (i32, i32) {
    %c0_i32 = arith.constant 0 : i32
    %c0_i32_0 = arith.constant 0 : i32
    %c0_i32_1 = arith.constant 0 : i32
    return %c0_i32, %c0_i32_0 : i32, i32
  }
  func.func @transform_3(%arg0: i32, %arg1: i32) -> (i32, i32) {
    %c0_i32 = arith.constant 0 : i32
    %c0_i32_0 = arith.constant 0 : i32
    return %c0_i32, %arg1 : i32, i32
  }
  func.func @transform_4(%arg0: i32, %arg1: i32) -> (i32, i32) {
    %c0_i32 = arith.constant 0 : i32
    %c0_i32_0 = arith.constant 0 : i32
    return %c0_i32, %arg1 : i32, i32
  }
  func.func @transform_5(%arg0: i32, %arg1: i32) -> (i32, i32) {
    %c0_i32 = arith.constant 0 : i32
    return %arg0, %arg1 : i32, i32
  }
}

</mosaic_0001>

<bundles_post_ra>
// kernel: tpu_custom_call.1
= control target key start
LH: loop header
LB: loop body
LE: loop exit
PB: predicated region body
PF: predicated region fallthrough
CT: control target
= control target key end

     0   :  { %10 = vsyncpa [#allocation3], 0  ;;  %s624_s0 = inlined_call_operand.hbm [shape: f32[16,128], index: 0, kind: input, shape index: {}]   ;;  %s625_s1 = inlined_call_operand.hbm [shape: bf16[128,128], index: 1, kind: input, shape index: {}]   ;;  %s626_s2 = inlined_call_operand.vmem [shape: f32[1,128], index: 2, kind: input, shape index: {}]   ;;  %s627_s3 = inlined_call_operand.hbm [shape: bf16[128,128], index: 3, kind: input, shape index: {}]   ;;  %s628_s4 = inlined_call_operand.vmem [shape: f32[1,128], index: 4, kind: input, shape index: {}]   ;;  %s629_s5 = inlined_call_operand.hbm [shape: f32[16,128], index: 5, kind: output, shape index: {}]  }
   0x1   :  { %11 = vsyncpa [#allocation6], 0  ;;  %s30_s20 = sshll.u32 %s625_s1, 4  ;;  %s31_s20 = int_to_ptr.hbm [resolvable:$true] %s30_s20 }
   0x2   :  { %12 = vsyncpa [#allocation4], 0  ;;  %s544_s21 = smov [#allocation5]   ;;  %s17_s25 = sshll.u32 %s624_s0, 4  ;;  %s18_s25 = int_to_ptr.hbm [resolvable:$true] %s17_s25 }
   0x3   :  { %s32_s22 = sshll.u32 %s544_s21, 4  ;;  %s545_s26 = smov 64   ;;  %s33_s22 = int_to_ptr.vmem [resolvable:$true] %s32_s22 }
   0x4   :  { %s546_s27 = smov 4   ;;  %s547_s28 = smov [#allocation2]  }
   0x5   :  { %38 = dma.hbm_to_vmem [thread:$0]  %s31_s20, 1024, %s33_s22, [#allocation6], %s545_s26, %s545_s26, %s546_s27  }
   0x6   :  { %s19_s29 = sshll.u32 %s547_s28, 4  ;;  %s548_s30 = smov 128   ;;  %s20_s29 = int_to_ptr.vmem [resolvable:$true] %s19_s29 }
   0x7   :  { %s549_s6 = smov 8   ;;  %s45_s8 = sshll.u32 %s627_s3, 4  ;;  %s46_s8 = int_to_ptr.hbm [resolvable:$true] %s45_s8 }
   0x8   :  { %25 = dma.hbm_to_vmem [thread:$0]  %s18_s25, 256, %s20_s29, [#allocation3], %s548_s30, %s548_s30, %s549_s6  }
   0x9   :  { %s550_s9 = smov [#allocation7]  }
   0xa   :  { %s47_s0 = sshll.u32 %s550_s9, 4  ;;  %s48_s0 = int_to_ptr.vmem [resolvable:$true] %s47_s0 }
   0xb   :  { %53 = dma.hbm_to_vmem [thread:$0]  %s46_s8, 1024, %s48_s0, [#allocation6], %s545_s26, %s545_s26, %s546_s27  }
   0xc   :  { %538 = dma.done.wait [#allocation3], 256  }
   0xd   :  { %539 = vsyncadd [#allocation3], 4294967040 }
   0xe   :  { %540 = dma.done.wait [#allocation6], 2048  }
   0xf   :  { %541 = vsyncadd [#allocation6], 4294965248  ;;  %v419_v0 = vld [vmem:[#allocation5 + $0x38] sm:$0xff]  ;;  %v418_v1 = vld [vmem:[#allocation5 + $0x30] sm:$0xff]  ;;  %s551_s12 = smov [#allocation8]   ;;  %s332_s16 = sshll.u32 %s629_s5, 4  ;;  %s333_s16 = int_to_ptr.hbm [resolvable:$true] %s332_s16 }
  0x10   :  { %139 = vmatpush.bf16.msra.mxu0 %v419_v0  ;;  %v417_v2 = vld [vmem:[#allocation5 + $0x28] sm:$0xff]  ;;  %v416_v3 = vld [vmem:[#allocation5 + $0x20] sm:$0xff]  ;;  %v415_v4 = vld [vmem:[#allocation5 + $0x18] sm:$0xff]  ;;  %s330_s13 = sshll.u32 %s551_s12, 4  ;;  %s331_s13 = int_to_ptr.vmem [resolvable:$true] %s330_s13 }
  0x11   :  { %v414_v5 = vld [vmem:[#allocation5 + $0x10] sm:$0xff]  ;;  %v413_v6 = vld [vmem:[#allocation5 + $0x8] sm:$0xff]  ;;  %v412_v7 = vld [vmem:[#allocation5] sm:$0xff] }
  0x12   :  { %v68_v8 = vld [vmem:[#allocation2] sm:$0xff]  ;;  %v69_v9 = vld [vmem:[#allocation2 + $0x8] sm:$0xff]  ;;  %v425_v18 = vld [vmem:[#allocation7 + $0x28] sm:$0xff] }
  0x13   :  { %v70_v10 = vpack.c.bf16 %v69_v9, %v68_v8  ;;  %v436_v11 = vld [vmem:[%s626_s2] ss:$0 sm:$0xff]  ;;  %v427_v12 = vld [vmem:[#allocation7 + $0x38] sm:$0xff]  ;;  %v424_v23 = vld [vmem:[#allocation7 + $0x20] sm:$0xff] }
  0x14   :  { %140 = vmatpush.bf16.msra.mxu0 %v418_v1  ;;  %310 = vmatpush.bf16.msra.mxu1 %v427_v12  ;;  %v426_v16 = vld [vmem:[#allocation7 + $0x30] sm:$0xff]  ;;  %v423_v29 = vld [vmem:[#allocation7 + $0x18] sm:$0xff]  ;;  %v421_v43 = vld [vmem:[#allocation7 + $0x8] sm:$0xff] }
  0x15   :  { %v422_v35 = vld [vmem:[#allocation7 + $0x10] sm:$0xff]  ;;  %v420_v50 = vld [vmem:[#allocation7] sm:$0xff] }
  0x18   :  { %141 = vmatpush.bf16.msra.mxu0 %v417_v2  ;;  %311 = vmatpush.bf16.msra.mxu1 %v426_v16 }
  0x1c   :  { %142 = vmatpush.bf16.msra.mxu0 %v416_v3  ;;  %312 = vmatpush.bf16.msra.mxu1 %v425_v18 }
  0x20   :  { %143 = vmatpush.bf16.msra.mxu0 %v415_v4  ;;  %313 = vmatpush.bf16.msra.mxu1 %v424_v23 }
  0x24   :  { %144 = vmatpush.bf16.msra.mxu0 %v414_v5  ;;  %314 = vmatpush.bf16.msra.mxu1 %v423_v29 }
  0x28   :  { %145 = vmatpush.bf16.msra.mxu0 %v413_v6  ;;  %315 = vmatpush.bf16.msra.mxu1 %v422_v35 }
  0x2c   :  { %146 = vmatpush.bf16.msra.mxu0 %v412_v7  ;;  %316 = vmatpush.bf16.msra.mxu1 %v421_v43 }
  0x2f   :  { %147 = vmatmul.bf16.vlgmr.msra.gmra.mxu0 %v70_v10 }
  0x30   :  { %317 = vmatpush.bf16.msra.mxu1 %v420_v50 }
  0xac   :  { %v148_v13 = vpop.f32.mrf.mxu0 }
  0xad   :  { %v597_v14 = vadd.f32 %v436_v11, %v148_v13 }
  0xaf   :  { %v600_v15 = vmul.f32 0.70710677, %v597_v14 }
  0xb1   :  { %v157_v17 = vmul.f32 %v600_v15, %v600_v15 }
  0xb3   :  { %v158_v19 = vmin.f32 %v157_v17, 16.0 }
  0xb4   :  { %v150_v20 = vpop.f32.mrf.mxu0 }
  0xb5   :  { %v159_v21 = vmul.f32 2.1237322e-06, %v158_v19  ;;  %v604_v22 = vadd.f32 %v436_v11, %v150_v20  ;;  %v170_v24 = vmul.f32 3.8918573e-05, %v158_v19 }
  0xb7   :  { %v160_v25 = vadd.f32 0.00028619796, %v159_v21  ;;  %v607_v26 = vmul.f32 0.70710677, %v604_v22  ;;  %v171_v27 = vadd.f32 0.001143296, %v170_v24 }
  0xb9   :  { %v197_v28 = vmul.f32 %v607_v26, %v607_v26  ;;  %v161_v30 = vmul.f32 %v160_v25, %v158_v19  ;;  %v172_v31 = vmul.f32 %v171_v27, %v158_v19 }
  0xbb   :  { %v198_v32 = vmin.f32 %v197_v28, 16.0  ;;  %v173_v33 = vadd.f32 0.014752088, %v172_v31  ;;  %v162_v37 = vadd.f32 0.0036580483, %v161_v30 }
  0xbd   :  { %v199_v34 = vmul.f32 2.1237322e-06, %v198_v32  ;;  %v210_v36 = vmul.f32 3.8918573e-05, %v198_v32  ;;  %v174_v38 = vmul.f32 %v173_v33, %v158_v19  ;;  %v163_v45 = vmul.f32 %v162_v37, %v158_v19 }
  0xbe   :  { %v154_v37 = vmul.f32 0.5, %v604_v22 }
  0xbf   :  { %v200_v39 = vadd.f32 0.00028619796, %v199_v34  ;;  %v211_v40 = vadd.f32 0.001143296, %v210_v36  ;;  %v175_v41 = vadd.f32 0.112945676, %v174_v38 }
  0xc0   :  { %v164_v52 = vadd.f32 0.05243302, %v163_v45  ;;  %v153_v36 = vmul.f32 0.5, %v597_v14 }
  0xc1   :  { %v201_v42 = vmul.f32 %v200_v39, %v198_v32  ;;  %v212_v44 = vmul.f32 %v211_v40, %v198_v32  ;;  %v176_v46 = vmul.f32 %v175_v41, %v158_v19 }
  0xc2   :  { %v165_v58 = vmul.f32 %v164_v52, %v158_v19 }
  0xc3   :  { %v202_v47 = vadd.f32 0.0036580483, %v201_v42  ;;  %v213_v48 = vadd.f32 0.014752088, %v212_v44  ;;  %v177_v49 = vadd.f32 0.4994258, %v176_v46 }
  0xc4   :  { %v166_v62 = vadd.f32 0.18741608, %v165_v58 }
  0xc5   :  { %v214_v51 = vmul.f32 %v213_v48, %v198_v32  ;;  %v178_v53 = vmul.f32 %v177_v49, %v158_v19  ;;  %v203_v54 = vmul.f32 %v202_v47, %v198_v32 }
  0xc6   :  { %v167_v3 = vmul.f32 %v166_v62, %v158_v19 }
  0xc7   :  { %v215_v55 = vadd.f32 0.112945676, %v214_v51  ;;  %v179_v56 = vadd.f32 1.0, %v178_v53  ;;  %v204_v59 = vadd.f32 0.05243302, %v203_v54 }
  0xc8   :  { %v168_v9 = vadd.f32 1.1283791, %v167_v3 }
  0xc9   :  { %v216_v57 = vmul.f32 %v215_v55, %v198_v32  ;;  %438 = vrcp.f32 %v179_v56  ;;  %v205_v63 = vmul.f32 %v204_v59, %v198_v32  ;;  %v191_v6 = vand.u32 2147483648, %v179_v56 }
  0xca   :  { %v189_v8 = vand.u32 2147483647, %v179_v56  ;;  %vm185_vm1 = vweird.f32 %v179_v56  ;;  %v169_v18 = vmul.f32 %v168_v9, %v600_v15 }
  0xcb   :  { %v217_v60 = vadd.f32 0.4994258, %v216_v57  ;;  %v206_v4 = vadd.f32 0.18741608, %v205_v63  ;;  %v192_v13 = vor.u32 1.1754944e-38, %v191_v6 }
  0xcc   :  { %vm190_vm3 = vcmp.eq.f32.partialorder %v189_v8, 8.507059e+37 }
  0xcd   :  { %v218_v61 = vmul.f32 %v217_v60, %v198_v32  ;;  %v207_v11 = vmul.f32 %v206_v4, %v198_v32 }
  0xcf   :  { %v219_v0 = vadd.f32 1.0, %v218_v61  ;;  %v439_v1 = vpop.eup %438  ;;  %v208_v21 = vadd.f32 1.1283791, %v207_v11 }
  0xd0   :  { %v181_v2 = vmul.f32 %v439_v1, %v179_v56  ;;  %vm186_vm0 = vweird.f32 %v439_v1 }
  0xd1   :  { %440 = vrcp.f32 %v219_v0  ;;  %vm187_vm2 = vmor %vm185_vm1, %vm186_vm0  ;;  %v231_v23 = vand.u32 2147483648, %v219_v0  ;;  %v229_v27 = vand.u32 2147483647, %v219_v0  ;;  %vm225_vm5 = vweird.f32 %v219_v0 }
  0xd2   :  { %v182_v5 = vsub.f32 1.0, %v181_v2  ;;  %v209_v30 = vmul.f32 %v208_v21, %v607_v26  ;;  %v437_v26 = vld [vmem:[%s628_s4] ss:$0 sm:$0xff] }
  0xd3   :  { %v232_v29 = vor.u32 1.1754944e-38, %v231_v23  ;;  %vm230_vm7 = vcmp.eq.f32.partialorder %v229_v27, 8.507059e+37 }
  0xd4   :  { %v183_v7 = vmul.f32 %v439_v1, %v182_v5 }
  0xd6   :  { %v184_v12 = vadd.f32 %v439_v1, %v183_v7 }
  0xd7   :  { %v441_v10 = vpop.eup %440 }
  0xd8   :  { %v221_v16 = vmul.f32 %v441_v10, %v219_v0  ;;  %v188_v17 = vsel %vm187_vm2, %v439_v1, %v184_v12  ;;  %vm226_vm4 = vweird.f32 %v441_v10 }
  0xd9   :  { %v193_v20 = vsel %vm190_vm3, %v192_v13, %v188_v17  ;;  %vm227_vm6 = vmor %vm225_vm5, %vm226_vm4 }
  0xda   :  { %v222_v19 = vsub.f32 1.0, %v221_v16  ;;  %v194_v24 = vmul.f32 %v193_v20, %v169_v18 }
  0xdc   :  { %v223_v25 = vmul.f32 %v441_v10, %v222_v19  ;;  %v378_v31 = vclamps-f32 %v194_v24, 1.0 }
  0xde   :  { %v224_v28 = vadd.f32 %v441_v10, %v223_v25  ;;  %v237_v35 = vadd.f32 1.0, %v378_v31 }
  0xe0   :  { %v228_v32 = vsel %vm227_vm6, %v441_v10, %v224_v28  ;;  %v239_v39 = vmul.f32 %v237_v35, %v153_v36 }
  0xe1   :  { %v233_v33 = vsel %vm230_vm7, %v232_v29, %v228_v32 }
  0xe2   :  { %v234_v34 = vmul.f32 %v233_v33, %v209_v30 }
  0xe4   :  { %v379_v15 = vclamps-f32 %v234_v34, 1.0 }
  0xe6   :  { %v238_v38 = vadd.f32 1.0, %v379_v15 }
  0xe8   :  { %v240_v40 = vmul.f32 %v238_v38, %v154_v37 }
  0xea   :  { %v241_v41 = vpack.c.bf16 %v240_v40, %v239_v39 }
  0xec   :  { %318 = vmatmul.bf16.vlgmr.msra.gmra.mxu1 %v241_v41 }
 0x169   :  { %v319_v42 = vpop.f32.mrf.mxu1 }
 0x16a   :  { %v320_v43 = vadd.f32 %v437_v26, %v319_v42 }
 0x16c   :  { %324 = vst [vmem:[#allocation8] sm:$0xff] %v320_v43 }
 0x171   :  { %v321_v14 = vpop.f32.mrf.mxu1 }
 0x172   :  { %v322_v22 = vadd.f32 %v437_v26, %v321_v14 }
 0x174   :  { %325 = vst [vmem:[#allocation8 + $0x8] sm:$0xff] %v322_v22 }
 0x175   :  { %338 = dma.vmem_to_hbm [thread:$0]  %s331_s13, 256, %s333_s16, [#allocation4], %s548_s30, %s548_s30, %s549_s6  }
 0x176   :  { %542 = dma.done.wait [#allocation4], 256  }
 0x177   :  { %543 = vsyncadd [#allocation4], 4294967040 }
 0x178   :  { %343 = vsyncpa [#allocation3], 1 }
 0x179   :  { %344 = vsyncpa [#allocation6], 1 }
 0x17a   :  { %345 = vsyncpa [#allocation4], 1 }

</bundles_post_ra>
